<compile_context>
chip_gen: v7x
topology: tpu7x:2x2x1
jax: 0.10.0
libtpu: 0.0.40
codegen_flags: <defaults>
</compile_context>

<pallas_src>
import functools

import jax
import jax.numpy as jnp
from jax import lax
from jax.experimental import pallas as pl
from jax.experimental.pallas import tpu as pltpu


def _fire_decoder_kernel(x_ref, w_sq_ref, b_sq_ref, w_ex_ref, b_ex_ref, out_ref,
                         *, H, W, Nb):
    """Nb batch images per step; channels on sublanes, flattened H*W on lanes.

    x_ref:    (Nb, Cin, H*W)    input images (lane index p = h*W + w)
    w_sq_ref: (Csq_p, Cin)      1x1 squeeze weight, rows zero-padded to 8k
    b_sq_ref: (Csq_p, 1)        squeeze bias (f32, zero-padded)
    w_ex_ref: (Cexp, 9*Csq_p)   3x3 expand weight, im2col (tap-major, chan-minor)
    b_ex_ref: (Cexp, 1)         expand bias (f32)
    out_ref:  (Nb, Cexp, H*W)
    """
    HW = H * W
    cdt = x_ref.dtype  # MXU dtype (bf16 inputs stay bf16); accumulation is f32.

    w_sq = w_sq_ref[...]
    b_sq = b_sq_ref[...]
    w_ex = w_ex_ref[...]
    b_ex = b_ex_ref[...]

    # Boundary masks, computed in-kernel (no col-index input). p = h*W + w.
    lane = lax.broadcasted_iota(jnp.int32, (1, HW), 1)
    if (W & (W - 1)) == 0:
        col = jnp.bitwise_and(lane, W - 1)
    else:
        col = jnp.remainder(lane, W)
    row_ok = {-1: lane >= W, 0: None, 1: lane < (H - 1) * W}
    col_ok = {-1: col >= 1, 0: None, 1: col <= W - 2}
    masks = {}
    for ky in (-1, 0, 1):
        for kx in (-1, 0, 1):
            m = None
            for part in (row_ok[ky], col_ok[kx]):
                if part is not None:
                    m = part if m is None else jnp.logical_and(m, part)
            masks[(ky, kx)] = m

    for b in range(Nb):  # static unroll; weights & masks stay resident.
        # ---- squeeze: 1x1 conv == (Csq_p, Cin) @ (Cin, HW) on the MXU + ReLU ----
        s = jnp.dot(w_sq, x_ref[b], preferred_element_type=jnp.float32)
        s = jnp.maximum(s + b_sq, 0.0)                        # (Csq_p, HW), f32

        # ---- im2col taps via XLU lane rolls + boundary masks (in registers) ----
        taps = []
        for ky in (-1, 0, 1):
            for kx in (-1, 0, 1):
                off = ky * W + kx                # want tap[p] = s[p + off] (valid p)
                if off == 0:
                    tap = s
                else:
                    # pltpu.roll matches jnp.roll: roll(s, sh)[p] = s[(p - sh) % HW]
                    tap = pltpu.roll(s, shift=(-off) % HW, axis=1)
                m = masks[(ky, kx)]
                if m is not None:
                    tap = jnp.where(m, tap, 0.0)
                taps.append(tap)
        # Csq_p is a multiple of 8 -> every concat offset is sublane-tile aligned.
        patch = jnp.concatenate(taps, axis=0).astype(cdt)     # (9*Csq_p, HW)

        # ---- expand: one MXU matmul with K = 9*Csq_p, + bias, ReLU ----
        acc = jnp.dot(w_ex, patch, preferred_element_type=jnp.float32)
        out_ref[b] = jnp.maximum(acc + b_ex, 0.0).astype(out_ref.dtype)


def _pick_batch_block(N, max_nb=8):
    """Largest divisor of N (<= max_nb) that still leaves >= 2 grid steps."""
    divisors = [nb for nb in range(1, min(N, max_nb) + 1) if N % nb == 0]
    two_plus = [nb for nb in divisors if N // nb >= 2]
    return max(two_plus) if two_plus else max(divisors)


def fire_decoder_pallas(x_flat, w_sq, b_sq, w_ex, b_ex, H, W):
    N, Cin, HW = x_flat.shape
    Csq_p = w_sq.shape[0]
    Cexp = w_ex.shape[0]
    isz = jnp.dtype(x_flat.dtype).itemsize

    Nb = _pick_batch_block(N)
    grid = (N // Nb,)

    flops = 2 * N * HW * (Cin * Csq_p + 9 * Csq_p * Cexp)
    bytes_accessed = ((N * Cin * HW + N * Cexp * HW) * isz
                      + (w_sq.size + w_ex.size) * isz
                      + (b_sq.size + b_ex.size) * 4)

    # Per-step VMEM: double-buffered input/output blocks + resident weights.
    est_step_vmem = ((2 * Nb * Cin * HW + 2 * Nb * Cexp * HW) * isz
                     + (w_sq.size + w_ex.size) * isz
                     + (b_sq.size + b_ex.size) * 4)
    try:  # generation-aware cap: ~32 MiB on v7x (64 MiB/TC), 48 MiB on v5e/v6e.
        vmem_cap = pltpu.get_tpu_info().vmem_capacity_bytes
    except Exception:
        vmem_cap = 64 * 2**20
    vmem_limit = int(min(min(48 * 2**20, vmem_cap // 2),
                         max(4 * 2**20, 4 * est_step_vmem)))

    kernel = functools.partial(_fire_decoder_kernel, H=H, W=W, Nb=Nb)

    return pl.pallas_call(
        kernel,
        out_shape=jax.ShapeDtypeStruct((N, Cexp, HW), x_flat.dtype),
        grid_spec=pltpu.PrefetchScalarGridSpec(
            num_scalar_prefetch=0,
            grid=grid,
            in_specs=[
                pl.BlockSpec((Nb, Cin, HW), lambda g: (g, 0, 0)),
                pl.BlockSpec((Csq_p, Cin), lambda g: (0, 0)),
                pl.BlockSpec((Csq_p, 1), lambda g: (0, 0)),
                pl.BlockSpec((Cexp, 9 * Csq_p), lambda g: (0, 0)),
                pl.BlockSpec((Cexp, 1), lambda g: (0, 0)),
            ],
            out_specs=pl.BlockSpec((Nb, Cexp, HW), lambda g: (g, 0, 0)),
        ),
        compiler_params=pltpu.CompilerParams(
            dimension_semantics=("parallel",),
            vmem_limit_bytes=vmem_limit,
        ),
        cost_estimate=pl.CostEstimate(
            flops=int(flops), transcendentals=0,
            bytes_accessed=int(bytes_accessed)),
    )(x_flat, w_sq, b_sq, w_ex, b_ex)


def fire_decoder(x_nchw, sq_w, sq_b, ex_w, ex_b):
    """Wrapper with PyTorch-style NCHW input and OIHW conv weights."""
    N, Cin, H, W = x_nchw.shape
    Csq = sq_w.shape[0]
    Cexp = ex_w.shape[0]
    cdt = x_nchw.dtype

    # Pad squeeze channels to the f32 sublane tile (8): taps become tile-aligned
    # slabs and the zero-padded rows/columns contribute exact zeros everywhere.
    Csq_p = ((Csq + 7) // 8) * 8

    # NCHW == (N, C, H*W): no activation transposes anywhere.
    x_flat = x_nchw.reshape(N, Cin, H * W)

    w_sq = jnp.pad(sq_w[:, :, 0, 0].astype(cdt), ((0, Csq_p - Csq), (0, 0)))
    b_sq = jnp.pad(sq_b.astype(jnp.float32), (0, Csq_p - Csq))[:, None]

    # (Cexp, Csq, 3, 3) -> (Cexp, 3, 3, Csq_p) -> (Cexp, 9*Csq_p): tap-major.
    w_ex = jnp.transpose(ex_w, (0, 2, 3, 1))
    w_ex = jnp.pad(w_ex, ((0, 0), (0, 0), (0, 0), (0, Csq_p - Csq)))
    w_ex = w_ex.reshape(Cexp, 9 * Csq_p).astype(cdt)
    b_ex = ex_b.astype(jnp.float32)[:, None]

    y = fire_decoder_pallas(x_flat, w_sq, b_sq, w_ex, b_ex, H, W)
    return y.reshape(N, Cexp, H, W)                           # already NCHW


def fire_decoder_reference(x_nchw, sq_w, sq_b, ex_w, ex_b):
    """Pure-JAX reference mirroring the PyTorch module (NCHW)."""
    s = lax.conv_general_dilated(x_nchw, sq_w, (1, 1), 'VALID',
                                 dimension_numbers=('NCHW', 'OIHW', 'NCHW'))
    s = jnp.maximum(s + sq_b[None, :, None, None], 0.0)
    e = lax.conv_general_dilated(s, ex_w, (1, 1), ((1, 1), (1, 1)),
                                 dimension_numbers=('NCHW', 'OIHW', 'NCHW'))
    return jnp.maximum(e + ex_b[None, :, None, None], 0.0)


if __name__ == "__main__":
    # Small, deterministic synthetic setup.
    N, H, W = 2, 16, 16
    inplanes, squeeze_planes, expand_planes = 8, 4, 16

    key = jax.random.PRNGKey(0)
    kx, k1, k2, k3, k4 = jax.random.split(key, 5)

    x = jax.random.normal(kx, (N, inplanes, H, W), jnp.float32)
    # Parameters with PyTorch Conv2d shapes (OIHW weights, 1-D biases).
    sq_w = 0.2 * jax.random.normal(k1, (squeeze_planes, inplanes, 1, 1), jnp.float32)
    sq_b = 0.1 * jax.random.normal(k2, (squeeze_planes,), jnp.float32)
    ex_w = 0.2 * jax.random.normal(k3, (expand_planes, squeeze_planes, 3, 3), jnp.float32)
    ex_b = 0.1 * jax.random.normal(k4, (expand_planes,), jnp.float32)

    out = fire_decoder(x, sq_w, sq_b, ex_w, ex_b)
    out = jax.block_until_ready(out)

    ref = fire_decoder_reference(x, sq_w, sq_b, ex_w, ex_b)
    assert out.shape == (N, expand_planes, H, W), out.shape
    err = float(jnp.max(jnp.abs(out - ref)))
    assert jnp.allclose(out, ref, atol=1e-3, rtol=1e-3), err

    print("KERNEL_OK")
</pallas_src>

<mosaic_0001>
module attributes {stable_mosaic.version = 11 : i64} {
  func.func @_fire_decoder_kernel(%arg0: i32, %arg1: memref<1x8x256xf32, #tpu.memory_space<vmem>>, %arg2: memref<8x8xf32, #tpu.memory_space<vmem>>, %arg3: memref<8x1xf32, #tpu.memory_space<vmem>>, %arg4: memref<16x72xf32, #tpu.memory_space<vmem>>, %arg5: memref<16x1xf32, #tpu.memory_space<vmem>>, %arg6: memref<1x16x256xf32, #tpu.memory_space<vmem>>) attributes {dimension_semantics = [#tpu.dimension_semantics<parallel>], iteration_bounds = array<i64: 2>, scalar_prefetch = 0 : i64, scratch_operands = 0 : i64, tpu.core_type = #tpu.core_type<tc>, window_params = [{transform_indices = @transform_0, window_bounds = array<i64: 1, 8, 256>}, {pipeline_mode = #tpu.pipeline_mode<synchronous>, transform_indices = @transform_1, window_bounds = array<i64: 8, 8>}, {pipeline_mode = #tpu.pipeline_mode<synchronous>, transform_indices = @transform_2, window_bounds = array<i64: 8, 1>}, {pipeline_mode = #tpu.pipeline_mode<synchronous>, transform_indices = @transform_3, window_bounds = array<i64: 16, 72>}, {pipeline_mode = #tpu.pipeline_mode<synchronous>, transform_indices = @transform_4, window_bounds = array<i64: 16, 1>}, {transform_indices = @transform_5, window_bounds = array<i64: 1, 16, 256>}]} {
    %c0 = arith.constant 0 : index
    %c0_0 = arith.constant 0 : index
    %0 = vector.load %arg2[%c0, %c0_0] : memref<8x8xf32, #tpu.memory_space<vmem>>, vector<8x8xf32>
    %c0_1 = arith.constant 0 : index
    %c0_2 = arith.constant 0 : index
    %1 = vector.load %arg3[%c0_1, %c0_2] : memref<8x1xf32, #tpu.memory_space<vmem>>, vector<8x1xf32>
    %c0_3 = arith.constant 0 : index
    %c0_4 = arith.constant 0 : index
    %2 = vector.load %arg4[%c0_3, %c0_4] : memref<16x72xf32, #tpu.memory_space<vmem>>, vector<16x72xf32>
    %c0_5 = arith.constant 0 : index
    %c0_6 = arith.constant 0 : index
    %3 = vector.load %arg5[%c0_5, %c0_6] : memref<16x1xf32, #tpu.memory_space<vmem>>, vector<16x1xf32>
    %4 = tpu.iota {dimensions = array<i32: 1>} : vector<1x256xi32>
    %c15_i32 = arith.constant 15 : i32
    %5 = vector.broadcast %c15_i32 : i32 to vector<1x256xi32>
    %6 = arith.andi %4, %5 : vector<1x256xi32>
    %c16_i32 = arith.constant 16 : i32
    %7 = vector.broadcast %c16_i32 : i32 to vector<1x256xi32>
    %8 = arith.cmpi sge, %4, %7 : vector<1x256xi32>
    %c240_i32 = arith.constant 240 : i32
    %9 = vector.broadcast %c240_i32 : i32 to vector<1x256xi32>
    %10 = arith.cmpi slt, %4, %9 : vector<1x256xi32>
    %c1_i32 = arith.constant 1 : i32
    %11 = vector.broadcast %c1_i32 : i32 to vector<1x256xi32>
    %12 = arith.cmpi sge, %6, %11 : vector<1x256xi32>
    %c14_i32 = arith.constant 14 : i32
    %13 = vector.broadcast %c14_i32 : i32 to vector<1x256xi32>
    %14 = arith.cmpi sle, %6, %13 : vector<1x256xi32>
    %15 = arith.andi %8, %12 : vector<1x256xi1>
    %16 = arith.andi %8, %14 : vector<1x256xi1>
    %17 = arith.andi %10, %12 : vector<1x256xi1>
    %18 = arith.andi %10, %14 : vector<1x256xi1>
    %c0_7 = arith.constant 0 : index
    %c0_8 = arith.constant 0 : index
    %c0_9 = arith.constant 0 : index
    %19 = vector.load %arg1[%c0_7, %c0_8, %c0_9] : memref<1x8x256xf32, #tpu.memory_space<vmem>>, vector<1x8x256xf32>
    %20 = vector.shape_cast %19 : vector<1x8x256xf32> to vector<8x256xf32>
    %cst = arith.constant dense<0.000000e+00> : vector<8x256xf32>
    %21 = tpu.matmul %0, %20, %cst {dimension_numbers = #tpu.dot_dimension_numbers<[1], [0], [0], [1], [0, 0, 1, 1], [], []>} : vector<8x8xf32>, vector<8x256xf32>, vector<8x256xf32> -> vector<8x256xf32>
    %22 = vector.broadcast %1 : vector<8x1xf32> to vector<8x256xf32>
    %23 = arith.addf %21, %22 : vector<8x256xf32>
    %cst_10 = arith.constant 0.000000e+00 : f32
    %24 = vector.broadcast %cst_10 : f32 to vector<8x256xf32>
    %25 = arith.maximumf %23, %24 : vector<8x256xf32>
    %c17_i32 = arith.constant 17 : i32
    %26 = tpu.dynamic_rotate %25 by %c17_i32 dim 1 : vector<8x256xf32>, i32 -> vector<8x256xf32>
    %cst_11 = arith.constant 0.000000e+00 : f32
    %27 = vector.shape_cast %15 : vector<1x256xi1> to vector<1x256xi1>
    %28 = vector.broadcast %27 : vector<1x256xi1> to vector<8x256xi1>
    %29 = vector.broadcast %cst_11 : f32 to vector<8x256xf32>
    %30 = arith.select %28, %26, %29 : vector<8x256xi1>, vector<8x256xf32>
    %c16_i32_12 = arith.constant 16 : i32
    %31 = tpu.dynamic_rotate %25 by %c16_i32_12 dim 1 : vector<8x256xf32>, i32 -> vector<8x256xf32>
    %cst_13 = arith.constant 0.000000e+00 : f32
    %32 = vector.shape_cast %8 : vector<1x256xi1> to vector<1x256xi1>
    %33 = vector.broadcast %32 : vector<1x256xi1> to vector<8x256xi1>
    %34 = vector.broadcast %cst_13 : f32 to vector<8x256xf32>
    %35 = arith.select %33, %31, %34 : vector<8x256xi1>, vector<8x256xf32>
    %c15_i32_14 = arith.constant 15 : i32
    %36 = tpu.dynamic_rotate %25 by %c15_i32_14 dim 1 : vector<8x256xf32>, i32 -> vector<8x256xf32>
    %cst_15 = arith.constant 0.000000e+00 : f32
    %37 = vector.shape_cast %16 : vector<1x256xi1> to vector<1x256xi1>
    %38 = vector.broadcast %37 : vector<1x256xi1> to vector<8x256xi1>
    %39 = vector.broadcast %cst_15 : f32 to vector<8x256xf32>
    %40 = arith.select %38, %36, %39 : vector<8x256xi1>, vector<8x256xf32>
    %c1_i32_16 = arith.constant 1 : i32
    %41 = tpu.dynamic_rotate %25 by %c1_i32_16 dim 1 : vector<8x256xf32>, i32 -> vector<8x256xf32>
    %cst_17 = arith.constant 0.000000e+00 : f32
    %42 = vector.shape_cast %12 : vector<1x256xi1> to vector<1x256xi1>
    %43 = vector.broadcast %42 : vector<1x256xi1> to vector<8x256xi1>
    %44 = vector.broadcast %cst_17 : f32 to vector<8x256xf32>
    %45 = arith.select %43, %41, %44 : vector<8x256xi1>, vector<8x256xf32>
    %c255_i32 = arith.constant 255 : i32
    %46 = tpu.dynamic_rotate %25 by %c255_i32 dim 1 : vector<8x256xf32>, i32 -> vector<8x256xf32>
    %cst_18 = arith.constant 0.000000e+00 : f32
    %47 = vector.shape_cast %14 : vector<1x256xi1> to vector<1x256xi1>
    %48 = vector.broadcast %47 : vector<1x256xi1> to vector<8x256xi1>
    %49 = vector.broadcast %cst_18 : f32 to vector<8x256xf32>
    %50 = arith.select %48, %46, %49 : vector<8x256xi1>, vector<8x256xf32>
    %c241_i32 = arith.constant 241 : i32
    %51 = tpu.dynamic_rotate %25 by %c241_i32 dim 1 : vector<8x256xf32>, i32 -> vector<8x256xf32>
    %cst_19 = arith.constant 0.000000e+00 : f32
    %52 = vector.shape_cast %17 : vector<1x256xi1> to vector<1x256xi1>
    %53 = vector.broadcast %52 : vector<1x256xi1> to vector<8x256xi1>
    %54 = vector.broadcast %cst_19 : f32 to vector<8x256xf32>
    %55 = arith.select %53, %51, %54 : vector<8x256xi1>, vector<8x256xf32>
    %c240_i32_20 = arith.constant 240 : i32
    %56 = tpu.dynamic_rotate %25 by %c240_i32_20 dim 1 : vector<8x256xf32>, i32 -> vector<8x256xf32>
    %cst_21 = arith.constant 0.000000e+00 : f32
    %57 = vector.shape_cast %10 : vector<1x256xi1> to vector<1x256xi1>
    %58 = vector.broadcast %57 : vector<1x256xi1> to vector<8x256xi1>
    %59 = vector.broadcast %cst_21 : f32 to vector<8x256xf32>
    %60 = arith.select %58, %56, %59 : vector<8x256xi1>, vector<8x256xf32>
    %c239_i32 = arith.constant 239 : i32
    %61 = tpu.dynamic_rotate %25 by %c239_i32 dim 1 : vector<8x256xf32>, i32 -> vector<8x256xf32>
    %cst_22 = arith.constant 0.000000e+00 : f32
    %62 = vector.shape_cast %18 : vector<1x256xi1> to vector<1x256xi1>
    %63 = vector.broadcast %62 : vector<1x256xi1> to vector<8x256xi1>
    %64 = vector.broadcast %cst_22 : f32 to vector<8x256xf32>
    %65 = arith.select %63, %61, %64 : vector<8x256xi1>, vector<8x256xf32>
    %66 = tpu.concatenate %30, %35, %40, %45, %25, %50, %55, %60, %65 in 0 : vector<8x256xf32>, vector<8x256xf32>, vector<8x256xf32>, vector<8x256xf32>, vector<8x256xf32>, vector<8x256xf32>, vector<8x256xf32>, vector<8x256xf32>, vector<8x256xf32> -> vector<72x256xf32>
    %cst_23 = arith.constant dense<0.000000e+00> : vector<16x256xf32>
    %67 = tpu.matmul %2, %66, %cst_23 {dimension_numbers = #tpu.dot_dimension_numbers<[1], [0], [0], [1], [0, 0, 1, 1], [], []>} : vector<16x72xf32>, vector<72x256xf32>, vector<16x256xf32> -> vector<16x256xf32>
    %68 = vector.broadcast %3 : vector<16x1xf32> to vector<16x256xf32>
    %69 = arith.addf %67, %68 : vector<16x256xf32>
    %cst_24 = arith.constant 0.000000e+00 : f32
    %70 = vector.broadcast %cst_24 : f32 to vector<16x256xf32>
    %71 = arith.maximumf %69, %70 : vector<16x256xf32>
    %c0_25 = arith.constant 0 : index
    %c0_26 = arith.constant 0 : index
    %c0_27 = arith.constant 0 : index
    %72 = vector.load %arg6[%c0_25, %c0_26, %c0_27] : memref<1x16x256xf32, #tpu.memory_space<vmem>>, vector<1x16x256xf32>
    %73 = vector.shape_cast %72 : vector<1x16x256xf32> to vector<16x256xf32>
    %74 = vector.shape_cast %71 : vector<16x256xf32> to vector<1x16x256xf32>
    tpu.vector_store %arg6[%c0_25, %c0_26, %c0_27], %74 {strides = array<i32>} : memref<1x16x256xf32, #tpu.memory_space<vmem>>, vector<1x16x256xf32>,
    return
  }
  func.func @transform_0(%arg0: i32) -> (i32, i32, i32) {
    %c0_i32 = arith.constant 0 : i32
    %c0_i32_0 = arith.constant 0 : i32
    %c0_i32_1 = arith.constant 0 : i32
    return %arg0, %c0_i32, %c0_i32_0 : i32, i32, i32
  }
  func.func @transform_1(%arg0: i32) -> (i32, i32) {
    %c0_i32 = arith.constant 0 : i32
    %c0_i32_0 = arith.constant 0 : i32
    %c0_i32_1 = arith.constant 0 : i32
    return %c0_i32, %c0_i32_0 : i32, i32
  }
  func.func @transform_2(%arg0: i32) -> (i32, i32) {
    %c0_i32 = arith.constant 0 : i32
    %c0_i32_0 = arith.constant 0 : i32
    %c0_i32_1 = arith.constant 0 : i32
    return %c0_i32, %c0_i32_0 : i32, i32
  }
  func.func @transform_3(%arg0: i32) -> (i32, i32) {
    %c0_i32 = arith.constant 0 : i32
    %c0_i32_0 = arith.constant 0 : i32
    %c0_i32_1 = arith.constant 0 : i32
    return %c0_i32, %c0_i32_0 : i32, i32
  }
  func.func @transform_4(%arg0: i32) -> (i32, i32) {
    %c0_i32 = arith.constant 0 : i32
    %c0_i32_0 = arith.constant 0 : i32
    %c0_i32_1 = arith.constant 0 : i32
    return %c0_i32, %c0_i32_0 : i32, i32
  }
  func.func @transform_5(%arg0: i32) -> (i32, i32, i32) {
    %c0_i32 = arith.constant 0 : i32
    %c0_i32_0 = arith.constant 0 : i32
    %c0_i32_1 = arith.constant 0 : i32
    return %arg0, %c0_i32, %c0_i32_0 : i32, i32, i32
  }
}

</mosaic_0001>

<bundles_post_ra>
// kernel: tpu_custom_call.1
= control target key start
LH: loop header
LB: loop body
LE: loop exit
PB: predicated region body
PF: predicated region fallthrough
CT: control target
= control target key end

     0   :  { %10 = vsyncpa [#allocation3], 0  ;;  %s1262_s0 = inlined_call_operand.hbm [shape: f32[2,8,256], index: 0, kind: input, shape index: {}]   ;;  %s1263_s1 = inlined_call_operand.vmem [shape: f32[8,8], index: 1, kind: input, shape index: {}]   ;;  %s1264_s2 = inlined_call_operand.vmem [shape: f32[8,1], index: 2, kind: input, shape index: {}]   ;;  %s1265_s3 = inlined_call_operand.vmem [shape: f32[16,72], index: 3, kind: input, shape index: {}]   ;;  %s1266_s4 = inlined_call_operand.vmem [shape: f32[16,1], index: 4, kind: input, shape index: {}]   ;;  %s1267_s5 = inlined_call_operand.hbm [shape: f32[2,16,256], index: 5, kind: output, shape index: {}]  }
   0x1   :  { %12 = vsyncpa [#allocation3 + $0x1], 0 }
   0x2   :  { %13 = vsyncpa [#allocation4], 0 }
   0x3   :  { %15 = vsyncpa [#allocation4 + $0x1], 0  ;;  %s949_s18 = smov 0   ;;  %s951_s19 = smov 0  }
   0x4   :  { %s953_s20 = smov 0   ;;  %s955_s21 = smov 0  }
   0x5 LB: > { %s970_s22 = sadd.s32 4294967295, %s903_s21   ;;  %s645_s23 = sadd.s32 4294967294, %s903_s21   ;;  %s903_s21 = sphi %s955_s21, %s1298_s21   ;;  %s899_s20 = sphi %s953_s20, %s1297_s20   ;;  %s895_s19 = sphi %s951_s19, %s1296_s19   ;;  %s891_s18 = sphi %s949_s18, %s1295_s18  }
   0x6   : > { %s974_s24 = sadd.s32 1, %s903_s21   ;;  %s28_s25 = sadd.s32 1, %s899_s20 }
   0x7   : > { %s25_s26 = ssub.s32 %s903_s21, %s974_s24  ;;  %p35_p0 = scmp.ne.s32.totalorder %s899_s20, %s895_s19 }
   0x8   : > { %p26_p1 = scmp.eq.s32.totalorder %s25_s26, 0  ;;  %p36_p2 = scmp.eq.s32.totalorder %s903_s21, 0 }
   0x9   : > { %p41_p3 = scmp.ne.s32.totalorder %s895_s19, %s891_s18  ;;  %p42_p4 = scmp.eq.s32.totalorder %s970_s22, 0 }
   0xa   : > { %s986_s27 = scalar_select %p26_p1, %s899_s20, %s28_s25  }
   0xb   : > { %p988_p5 = por %p36_p2, %p35_p0  ;;  %p992_p6 = por %p42_p4, %p41_p3 }
   0xc   : > { %p149_p7 = scmp.eq.s32.totalorder %s970_s22, 1  ;;  %p155_p8 = scmp.eq.s32.totalorder %s645_s23, 1 }
   0xd   : > { %p724_p10 = scmp.lt.s32.totalorder %s903_s21, 2  ;;  %s187_s7 = sand.u32 1, %s899_s20  }
   0xe   : > { %p999_p11 = por %p149_p7, %p35_p0  ;;  %p1003_p12 = por %p155_p8, %p41_p3 }
   0xf   : > { %s676_s8 = sshll.u32 %s903_s21, 8  ;;  %s648_s9 = sshll.u32 %s187_s7, 4 }
  0x10   : > { %s1271_s30 = scalar_select %p999_p11, 1, 0 }
  0x11   : > { %s1272_s6 = scalar_select %p1003_p12, 1, 0 }
  0x12   : > { %s1012_s12 = scalar_lea.hbm %s1262_s0, %s676_s8  ;;  %s191_s13 = scalar_lea.vmem [#allocation2], %s648_s9 }
  0x13   : > { %s199_s14 = sshll.u32 %s191_s13, 4  ;;  %p1016_p13 = pnand %p724_p10, %p988_p5  ;;  %s1020_s14 = int_to_ptr.vmem [resolvable:$true] %s199_s14 }
  0x14   : > { %s188_s16 = scalar_lea.sflag [#allocation3], %s187_s7  ;;  %s807_s17 = scalar_lea.hbm %s1012_s12, 256 }
  0x15   : > { %p808_p2 = scmp.ne.s32.totalorder %s1012_s12, %s807_s17  ;;  %p809_p3 = pneg %p1016_p13 }
  0x16   : > { %s812_s26 = scalar_lea.hbm %s1262_s0, 512  ;;  %p813_p5 = scmp.lt.u32.totalorder %s1012_s12, %s1262_s0 }
  0x17   : > { %p810_p4 = pnand %p809_p3, %p808_p2  ;;  %p814_p8 = scmp.lt.u32.totalorder %s812_s26, %s807_s17 }
  0x18   : > { %p816_p9 = scmp.lt.u32.totalorder %s807_s17, %s1012_s12 }
  0x19   : > { %p811_p7 = pneg %p810_p4  ;;  %p815_p10 = por %p814_p8, %p813_p5 }
  0x1b   : > { %p817_p0 = por %p816_p9, %p815_p10 }
  0x1d   : > { %p818_p1 = pnand %p817_p0, %p811_p7 }
  0x1f   : > { %821 = shalt.err (!%p818_p1)
}
  0x20   : > { %s822_s7 = scalar_lea.vmem %s1020_s14, 256  ;;  %s905_s9 = smov [#allocation2]  }
  0x21   : > { %p823_p2 = scmp.ne.s32.totalorder %s1020_s14, %s822_s7  ;;  %s827_s10 = sshll.u32 %s905_s9, 4  ;;  %s828_s10 = int_to_ptr.vmem [resolvable:$false] %s827_s10 }
  0x22   : > { %s829_s11 = scalar_lea.vmem %s828_s10, 512  ;;  %p830_p11 = scmp.lt.s32.totalorder %s1020_s14, %s828_s10 }
  0x23   : > { %p825_p4 = pnand %p823_p2, %p809_p3  ;;  %p831_p5 = scmp.lt.s32.totalorder %s829_s11, %s822_s7 }
  0x25   : > { %p826_p12 = pneg %p825_p4  ;;  %p832_p8 = por %p831_p5, %p830_p11 }
  0x27   : > { %p833_p9 = pnand %p832_p8, %p826_p12 }
  0x29   : > { %836 = shalt.err (!%p833_p9)
}
  0x2a   : > { %719 = dma.hbm_to_vmem [thread:$0]  (!%p1016_p13), %s1012_s12, 256, %s1020_s14, %s188_s16  }
  0x2b   : > { %p1274_p0 = scmp.lt.s32.totalorder %s903_s21, 3  ;;  %p1275_p1 = scmp.ge.s32.totalorder %s903_s21, 1 }
  0x2d   : > { %p205_p3 = pnand %p1275_p1, %p1274_p0 }
  0x2e   : > { %s1054_s13 = sand.u32 (!%p205_p3), 1, %s895_s19  }
  0x2f   : > { %208 = sbr.rel (%p205_p3) target bundleno = 650 (0x28a), region = 40  ;;  %s652_s17 = sshll.u32 (!%p205_p3), %s1054_s13, 4 }
  0x30   : > { %s211_s23 = scalar_lea.sflag (!%p205_p3), [#allocation3], %s1054_s13  ;;  %s214_s25 = scalar_lea.vmem (!%p205_p3), [#allocation2], %s652_s17 }
  0x36   : > { %882 = dma.done.wait (%p992_p6), %s211_s23, 256  }
  0x37   : > { %884 = vsyncadd (%p992_p6), %s211_s23, 4294967040  ;;  %v906_v0 = vmov 0.0   ;;  %v907_v1 = vmov 0   ;;  %v269_v2 = vld [vmem:[%s214_s25 + $0x8] sm:$0xff]  ;;  %v268_v3 = vld [vmem:[%s214_s25] sm:$0xff]  ;;  %vm275_vm0 = vcmask 64512   ;;  %v247_v16 = vlaneseq }
  0x38   : > { %343 = vmatprep.mubr.f32.mxu0 %v906_v0  ;;  %770 = vset.pattern.permute.xlu0 %v907_v1  ;;  %v241_v4 = vld [vmem:[%s1263_s1] sm:$0xff]  ;;  %s908_s29 = smov 16   ;;  %s909_s26 = smov 17   ;;  %v246_v15 = vld [vmem:[%s1266_s4 + $0x8] sm:$0xff]  ;;  %vm916_vm9 = vmmov 1  }
  0x39   : > { %543 = vmatprep.mubr.f32.mxu1 %v906_v0  ;;  %806 = vset.pattern.permute.xlu1 %v907_v1  ;;  %v242_v5 = vld [vmem:[%s1264_s2] sm:$0xff]  ;;  %s910_s28 = smov 15   ;;  %s911_s8 = smov 1   ;;  %v1083_v17 = vand.u32 127, %v247_v16 }
  0x3a   : > { %279 = vmatprep.subr.mxu0 %v269_v2  ;;  %272 = vperm.xlu0 %770, %v242_v5   ;;  %s912_s7 = smov 127   ;;  %s913_s9 = smov 113   ;;  %v245_v14 = vld [vmem:[%s1266_s4] sm:$0xff] }
  0x3b   : > { %280 = vmatpush1.msra.mxu0 %v268_v3  ;;  %s914_s10 = smov 112   ;;  %s915_s11 = smov 111   ;;  %v1086_v18 = vadd.s32 128, %v1083_v17  ;;  %v250_v19 = vand.u32 15, %v1083_v17  ;;  %vm252_vm1 = vcmp.ge.s32.totalorder %v1083_v17, 16  ;;  %vm369_vm3 = vcmp.lt.s32.totalorder %v1083_v17, 16 }
  0x3c   : > { %654 = vmatmul.mubr.msk.f32.vlgmr.msra.gmra.mrb[0].mxu0 %vm275_vm0, %v241_v4  ;;  %vm356_vm4 = vcmp.lt.s32.totalorder %v1083_v17, 17  ;;  %vm382_vm7 = vcmp.lt.s32.totalorder %v1083_v17, 15  ;;  %vm395_vm11 = vcmp.lt.s32.totalorder %v1083_v17, 1  ;;  %vm408_vm0 = vcmp.lt.s32.totalorder %v1083_v17, 127  ;;  %p1292_p11 = scmp.ne.s32.totalorder %s1271_s30, 0  ;;  %s917_s25 = smov [#allocation5]  }
  0x3d   : > { %537 = vmatprep.mubr.f32.mxu0 %v906_v0  ;;  %v251_v20 = vand.u32 15, %v1086_v18  ;;  %vm1091_vm2 = vcmp.ge.s32.totalorder %v250_v19, 1  ;;  %vm1106_vm8 = vcmp.le.s32.totalorder %v250_v19, 14  ;;  %s841_s12 = sshll.u32 %s917_s25, 4  ;;  %s842_s12 = int_to_ptr.vmem [resolvable:$false] %s841_s12 }
  0x3e   : > { %vm260_vm6 = vmand %vm252_vm1, %vm1091_vm2  ;;  %s843_s14 = scalar_lea.vmem %s842_s12, 1024 }
  0x3f   : > { %vm1097_vm5 = vcmp.ge.s32.totalorder %v251_v20, 1  ;;  %vm1116_vm12 = vmpackc.low %vm252_vm1, %vm260_vm6  ;;  %vm1120_vm13 = vcmp.le.s32.totalorder %v251_v20, 14 }
  0x40   : > { %vm679_vm10 = vmpackc.low %vm916_vm9, %vm1097_vm5 }
  0x41   : > { %vm1128_vm14 = vmand %vm252_vm1, %vm1106_vm8 }
  0x42   : > { %vm685_vm15 = vmpackc.low %vm1097_vm5, %vm1120_vm13 }
  0x43   : > { %vm688_vm1 = vmpackc.low %vm1091_vm2, %vm1128_vm14 }
  0x44   : > { %vm1165_vm6 = vmpackc.low %vm1106_vm8, %vm916_vm9 }
  0x45   : > { %vm700_vm14 = vmpackc.low %vm916_vm9, %vm1091_vm2 }
  0xb9   : > { %v273_v6 = vpop.permute.xlu0 %272 }
 0x10f   : > { %v345_v7 = vpop.f32.mrb[0].mxu0 }
 0x110   : > { %v346_v8 = vadd.f32 %v345_v7, %v273_v6  ;;  %v347_v9 = vpop.f32.mrb[1].mxu0 }
 0x111   : > { %v348_v10 = vadd.f32 %v347_v9, %v273_v6 }
 0x112   : > { %v1068_v11 = vmax.f32 %v346_v8, 0.0 }
 0x113   : > { %v1070_v12 = vmax.f32 %v348_v10, 0.0 }
 0x115   : > { %v776_v13 = vpack.i.bf16 %v1070_v12, %v1068_v11 }
 0x117   : > { %777 = vrot.lane.b32.xlu1 %v776_v13, %s908_s29  ;;  %772 = vrot.lane.b32.xlu0 %v776_v13, %s909_s26 }
 0x11b   : > { %782 = vrot.lane.b32.xlu1 %v776_v13, %s910_s28  ;;  %787 = vrot.lane.b32.xlu0 %v776_v13, %s911_s8  ;;  %s653_s28 = sshll.u32 %s1054_s13, 5 }
 0x11c   : > { %s240_s8 = scalar_lea.vmem [#allocation5], %s653_s28 }
 0x11f   : > { %792 = vrot.lane.b32.xlu1 %v776_v13, %s912_s7  ;;  %797 = vrot.lane.b32.xlu0 %v776_v13, %s913_s9  ;;  %s572_s7 = sshll.u32 %s240_s8, 4  ;;  %s677_s9 = sshll.u32 %s970_s22, 9  ;;  %s1212_s7 = int_to_ptr.vmem [resolvable:$true] %s572_s7 }
 0x120   : > { %s1217_s17 = scalar_lea.hbm %s1267_s5, %s677_s9  ;;  %s559_s22 = scalar_lea.sflag [#allocation4], %s1054_s13 }
 0x121   : > { %s837_s23 = scalar_lea.vmem %s1212_s7, 512  ;;  %p844_p7 = scmp.lt.s32.totalorder %s1212_s7, %s842_s12 }
 0x122   : > { %p838_p6 = scmp.ne.s32.totalorder %s1212_s7, %s837_s23  ;;  %p845_p10 = scmp.lt.s32.totalorder %s843_s14, %s837_s23 }
 0x123   : > { %802 = vrot.lane.b32.xlu1 %v776_v13, %s914_s10  ;;  %443 = vrot.lane.b32.xlu0 %v1068_v11, %s915_s11  ;;  %v244_v13 = vld [vmem:[%s1265_s3 + $0x8] sm:$0xff] }
 0x124   : > { %p839_p12 = pnand %p838_p6, %p1292_p11  ;;  %p846_p2 = por %p845_p10, %p844_p7 }
 0x126   : > { %p840_p13 = pneg %p839_p12 }
 0x127   : > { %445 = vrot.lane.b32.xlu1 %v1070_v12, %s915_s11  ;;  %458 = vperm.xlu0 %770, %v245_v14  }
 0x128   : > { %p847_p4 = pnand %p846_p2, %p840_p13 }
 0x12b   : > { %463 = vperm.xlu1 %806, %v246_v15  }
 0x189   : > { %v778_v22 = vpop.permute.xlu1 %777  ;;  %v773_v23 = vpop.permute.xlu0 %772 }
 0x18a   : > { %v780_v25 = vunpack.i.h.bf16 %v778_v22  ;;  %v779_v26 = vunpack.i.l.bf16 %v778_v22  ;;  %v775_v27 = vunpack.i.h.bf16 %v773_v23  ;;  %v774_v28 = vunpack.i.l.bf16 %v773_v23 }
 0x18c   : > { %v370_v30 = vsel %vm369_vm3, %v779_v26, %v780_v25  ;;  %v371_v31 = vsel %vm369_vm3, %v780_v25, %v779_v26  ;;  %v357_v32 = vsel %vm356_vm4, %v774_v28, %v775_v27  ;;  %v358_v33 = vsel %vm356_vm4, %v775_v27, %v774_v28  ;;  %vm1153_vm4 = vmpackc.low %vm1120_vm13, %vm916_vm9 }
 0x18d   : > { %v678_v34 = vpack.c.bf16 %v370_v30, %v357_v32  ;;  %v681_v35 = vpack.c.bf16 %v371_v31, %v358_v33  ;;  %v783_v36 = vpop.permute.xlu1 %782  ;;  %v788_v37 = vpop.permute.xlu0 %787  ;;  %vm255_vm3 = vcmp.lt.s32.totalorder %v1086_v18, 240 }
 0x18e   : > { %v785_v40 = vunpack.i.h.bf16 %v783_v36  ;;  %v784_v41 = vunpack.i.l.bf16 %v783_v36  ;;  %v790_v42 = vunpack.i.h.bf16 %v788_v37  ;;  %v789_v43 = vunpack.i.l.bf16 %v788_v37 }
 0x18f   : > { %680 = vmatprep.subr.msk.bf16.mxu0 %vm679_vm10, %v678_v34  ;;  %702 = vmatprep.subr.msk.bf16.mxu1 %vm679_vm10, %v678_v34  ;;  %vm434_vm10 = vcmp.lt.s32.totalorder %v1083_v17, 112 }
 0x190   : > { %v383_v45 = vsel %vm382_vm7, %v784_v41, %v785_v40  ;;  %v384_v46 = vsel %vm382_vm7, %v785_v40, %v784_v41  ;;  %v396_v47 = vsel %vm395_vm11, %v789_v43, %v790_v42  ;;  %v397_v48 = vsel %vm395_vm11, %v790_v42, %v789_v43  ;;  %683 = vmatpush1.bf16.msk.msra.mxu0 %vm1116_vm12, %v681_v35  ;;  %vm265_vm11 = vmand %vm255_vm3, %vm1097_vm5 }
 0x191   : > { %v684_v49 = vpack.c.bf16 %v396_v47, %v383_v45  ;;  %v687_v50 = vpack.c.bf16 %v397_v48, %v384_v46  ;;  %707 = vmatpush1.bf16.msk.msra.mxu1 %vm1116_vm12, %v681_v35  ;;  %v793_v51 = vpop.permute.xlu1 %792  ;;  %v798_v52 = vpop.permute.xlu0 %797  ;;  %vm421_vm7 = vcmp.lt.s32.totalorder %v1083_v17, 113  ;;  %vm697_vm12 = vmpackc.low %vm255_vm3, %vm265_vm11  ;;  %vm447_vm5 = vcmp.lt.s32.totalorder %v1083_v17, 111 }
 0x192   : > { %v795_v53 = vunpack.i.h.bf16 %v793_v51  ;;  %v794_v54 = vunpack.i.l.bf16 %v793_v51  ;;  %v800_v58 = vunpack.i.h.bf16 %v798_v52  ;;  %v799_v59 = vunpack.i.l.bf16 %v798_v52 }
 0x193   : > { %686 = vmatprep.subr.msk.bf16.mxu0 %vm685_vm15, %v684_v49  ;;  %703 = vmatprep.subr.msk.bf16.mxu1 %vm685_vm15, %v684_v49  ;;  %vm267_vm15 = vmand %vm255_vm3, %vm1120_vm13 }
 0x194   : > { %v409_v56 = vsel %vm408_vm0, %v794_v54, %v795_v53  ;;  %v410_v57 = vsel %vm408_vm0, %v795_v53, %v794_v54  ;;  %689 = vmatpush1.bf16.msk.msra.mxu0 %vm688_vm1, %v687_v50  ;;  %v422_v2 = vsel %vm421_vm7, %v799_v59, %v800_v58  ;;  %v423_v3 = vsel %vm421_vm7, %v800_v58, %v799_v59 }
 0x195   : > { %v690_v61 = vpack.c.bf16 %v410_v57, %v1070_v12  ;;  %v693_v62 = vpack.c.bf16 %v409_v56, %v1068_v11  ;;  %708 = vmatpush1.bf16.msk.msra.mxu1 %vm688_vm1, %v687_v50  ;;  %v803_v63 = vpop.permute.xlu1 %802  ;;  %v444_v9 = vpop.permute.xlu0 %443  ;;  %v243_v11 = vld [vmem:[%s1265_s3] sm:$0xff]  ;;  %vm466_vm0 = vcmask 588800  }
 0x196   : > { %v805_v0 = vunpack.i.h.bf16 %v803_v63  ;;  %v804_v1 = vunpack.i.l.bf16 %v803_v63 }
 0x197   : > { %692 = vmatprep.subr.msk.bf16.mxu0 %vm1153_vm4, %v690_v61  ;;  %704 = vmatprep.subr.msk.bf16.mxu1 %vm1153_vm4, %v690_v61 }
 0x198   : > { %v435_v4 = vsel %vm434_vm10, %v804_v1, %v805_v0  ;;  %v436_v5 = vsel %vm434_vm10, %v805_v0, %v804_v1  ;;  %695 = vmatpush1.bf16.msk.msra.mxu0 %vm1165_vm6, %v693_v62 }
 0x199   : > { %v696_v6 = vpack.c.bf16 %v436_v5, %v423_v3  ;;  %v699_v7 = vpack.c.bf16 %v435_v4, %v422_v2  ;;  %709 = vmatpush1.bf16.msk.msra.mxu1 %vm1165_vm6, %v693_v62  ;;  %v446_v8 = vpop.permute.xlu1 %445 }
 0x19a   : > { %v449_v10 = vsel %vm447_vm5, %v446_v8, %v444_v9  ;;  %v448_v12 = vsel %vm447_vm5, %v444_v9, %v446_v8 }
 0x19b   : > { %698 = vmatprep.subr.msk.bf16.mxu0 %vm697_vm12, %v696_v6  ;;  %705 = vmatprep.subr.msk.bf16.mxu1 %vm697_vm12, %v696_v6 }
 0x19c   : > { %701 = vmatpush1.bf16.msk.msra.mxu0 %vm700_vm14, %v699_v7 }
 0x19d   : > { %710 = vmatpush1.bf16.msk.msra.mxu1 %vm700_vm14, %v699_v7  ;;  %667 = vmatprep.subr.msk.mxu0 %vm267_vm15, %v449_v10 }
 0x19e   : > { %706 = vmatprep.subr.msk.mxu1 %vm267_vm15, %v449_v10 }
 0x1a0   : > { %668 = vmatpush1.msk.msra.mxu0 %vm1106_vm8, %v448_v12 }
 0x1a1   : > { %711 = vmatpush1.msk.msra.mxu1 %vm1106_vm8, %v448_v12  ;;  %669 = vmatmul.mubr.msk.f32.vlgmr.msra.gmra.mrb[2].mxu0 %vm466_vm0, %v243_v11 }
 0x1a2   : > { %670 = vmatmul.mubr.msk.f32.vlgmr.msra.gmra.mrb[0].mxu1 %vm466_vm0, %v244_v13 }
 0x1a6   : > { %v459_v15 = vpop.permute.xlu0 %458 }
 0x1aa   : > { %v464_v14 = vpop.permute.xlu1 %463 }
 0x274   : > { %v539_v16 = vpop.f32.mrb[2].mxu0 }
 0x275   : > { %v540_v17 = vadd.f32 %v539_v16, %v459_v15  ;;  %v545_v18 = vpop.f32.mrb[0].mxu1  ;;  %v541_v19 = vpop.f32.mrb[3].mxu0 }
 0x276   : > { %v546_v20 = vadd.f32 %v545_v18, %v464_v14  ;;  %v542_v21 = vadd.f32 %v541_v19, %v459_v15  ;;  %v547_v22 = vpop.f32.mrb[1].mxu1 }
 0x277   : > { %v550_v23 = vmax.f32 %v540_v17, 0.0  ;;  %v548_v24 = vadd.f32 %v547_v22, %v464_v14 }
 0x278   : > { %v552_v25 = vmax.f32 %v546_v20, 0.0  ;;  %v551_v26 = vmax.f32 %v542_v21, 0.0 }
 0x279   : > { %554 = vst [vmem:[%s240_s8] sm:$0xff] %v550_v23  ;;  %v553_v27 = vmax.f32 %v548_v24, 0.0 }
 0x27a   : > { %556 = vst [vmem:[%s240_s8 + $0x10] sm:$0xff] %v552_v25  ;;  %555 = vst [vmem:[%s240_s8 + $0x8] sm:$0xff] %v551_v26 }
 0x27b   : > { %557 = vst [vmem:[%s240_s8 + $0x18] sm:$0xff] %v553_v27 }
 0x27c   : > { %850 = shalt.err (!%p847_p4)
}
 0x27d   : > { %s851_s15 = scalar_lea.hbm %s1217_s17, 512  ;;  %s855_s28 = scalar_lea.hbm %s1267_s5, 1024 }
 0x27e   : > { %p852_p5 = scmp.ne.s32.totalorder %s1217_s17, %s851_s15  ;;  %p856_p0 = scmp.lt.u32.totalorder %s1217_s17, %s1267_s5 }
 0x27f   : > { %p857_p1 = scmp.lt.u32.totalorder %s855_s28, %s851_s15  ;;  %p859_p6 = scmp.lt.u32.totalorder %s851_s15, %s1217_s17 }
 0x280   : > { %p853_p8 = pnand %p852_p5, %p1292_p11 }
 0x281   : > { %p858_p3 = por %p857_p1, %p856_p0 }
 0x282   : > { %p854_p9 = pneg %p853_p8 }
 0x283   : > { %p860_p12 = por %p859_p6, %p858_p3 }
 0x285   : > { %p861_p13 = pnand %p860_p12, %p854_p9 }
 0x287   : > { %864 = shalt.err (!%p861_p13)
}
 0x288   : > { %s918_s10 = smov 256  }
 0x289   : > { %714 = dma.vmem_to_hbm [thread:$0]  (%p1292_p11), %s1212_s7, 512, %s1217_s17, %s559_s22, %s918_s10, %s918_s10, %s908_s29  }
 0x28a PF: > { %s587_s11 = sand.u32 1, %s891_s18   ;;  %p1293_p7 = scmp.ne.s32.totalorder %s1272_s6, 0 }
 0x28b   : > { %p1294_p10 = scmp.ge.s32.totalorder %s903_s21, 2  ;;  %s588_s23 = scalar_lea.sflag [#allocation4], %s587_s11 }
 0x28d   : > { %p721_p2 = pnand %p1294_p10, %p1293_p7 }
 0x28f   : > { %886 = dma.done.wait (!%p721_p2), %s588_s23, 512  }
 0x290   : > { %888 = vsyncadd (!%p721_p2), %s588_s23, 4294966784  ;;  %p18_p4 = scmp.ge.s32.totalorder %s974_s24, 4   ;;  %s1295_s18 = smov %s895_s19 }
 0x291   : > { %s1296_s19 = smov %s899_s20  ;;  %s1297_s20 = smov %s986_s27 }
 0x292   : > { %s1298_s21 = smov %s974_s24  ;;  %20 = sbr.rel (!%p18_p4) target bundleno = 5 (0x5), region = 85 }
 0x299   :  { %593 = vsyncpa [#allocation3], 1 }
 0x29a   :  { %595 = vsyncpa [#allocation3 + $0x1], 1 }
 0x29b   :  { %596 = vsyncpa [#allocation4], 1 }
 0x29c   :  { %598 = vsyncpa [#allocation4 + $0x1], 1 }

</bundles_post_ra>
